<compile_context>
chip_gen: v7x
topology: tpu7x:2x2x1
jax: 0.10.0
libtpu: 0.0.40
codegen_flags: <defaults>
</compile_context>

<pallas_src>
import jax
import jax.numpy as jnp
from jax.experimental import pallas as pl
from jax.experimental.pallas import tpu as pltpu


def _round_up(x: int, m: int) -> int:
    return ((x + m - 1) // m) * m


# ---------------------------------------------------------------------------
# Kernels
# ---------------------------------------------------------------------------

def _linear_kernel_full_k(x_ref, wt_ref, b_ref, o_ref):
    # Whole K stripe resident: single MXU pass, bias + cast epilogue, one store.
    acc = jnp.dot(x_ref[...].astype(jnp.bfloat16), wt_ref[...],
                  preferred_element_type=jnp.float32)
    o_ref[...] = (acc + b_ref[...]).astype(o_ref.dtype)


def _linear_kernel_split_f32out(x_ref, wt_ref, b_ref, o_ref):
    # Split-K, f32 output: accumulate directly into the K-resident output
    # block (its index_map ignores k) -> no VMEM scratch needed.
    k = pl.program_id(2)

    @pl.when(k == 0)
    def _():
        o_ref[...] = jnp.broadcast_to(b_ref[...], o_ref.shape)

    o_ref[...] += jnp.dot(x_ref[...].astype(jnp.bfloat16), wt_ref[...],
                          preferred_element_type=jnp.float32)


def _linear_kernel_split_acc(x_ref, wt_ref, b_ref, o_ref, acc_ref):
    # Split-K, low-precision output: f32 VMEM accumulator + epilogue cast.
    k = pl.program_id(2)

    @pl.when(k == 0)
    def _():
        acc_ref[...] = jnp.broadcast_to(b_ref[...], acc_ref.shape)

    acc_ref[...] += jnp.dot(x_ref[...].astype(jnp.bfloat16), wt_ref[...],
                            preferred_element_type=jnp.float32)

    @pl.when(k == pl.num_programs(2) - 1)
    def _():
        o_ref[...] = acc_ref[...].astype(o_ref.dtype)


# ---------------------------------------------------------------------------
# Tile selection + wrapper
# ---------------------------------------------------------------------------

def _select_tiles(M, K_pad, N, budget_bytes):
    """Pick (tm, tn, tk), lane-dense and (8,128)-aligned, fitting the budget."""
    # M tile: one block for small M, 512 rows for large M.
    if M < 8:
        tm = M                      # equals the full dim -> allowed
    elif M <= 512:
        tm = (M // 8) * 8
    else:
        tm = 512
    # N tile: wide lane-dense output tiles -> fewer, larger unmasked stores.
    if N < 128:
        tn = N                      # equals the full dim -> allowed
    else:
        tn = 512 if N % 512 == 0 else (256 if N % 256 == 0 else 128)

    def fits(tm_, tn_, tk_):
        # double-buffered x(f32) + W^T(bf16) + bias, double-buffered out(f32)
        fp = 2 * (tm_ * tk_ * 4 + tk_ * tn_ * 2 + tn_ * 4) + 2 * tm_ * tn_ * 4
        return fp <= budget_bytes

    # Prefer a fully collapsed K stripe; otherwise the largest aligned divisor.
    for cand in (K_pad, 2048, 1024, 512, 256, 128):
        if cand <= K_pad and K_pad % cand == 0 and fits(tm, tn, cand):
            return tm, tn, cand
    return tm, tn, 128


def linear_pallas(x2d, wt_bf16, b_f32, vmem_limit_bytes):
    """y = x2d @ W^T + b with a tiled, pipelined Pallas kernel.

    wt_bf16: (K_pad, N) pre-transposed bf16 weight, zero-padded on K at init.
    b_f32  : (1, N)     f32 bias.
    Returns (M, N) in x2d.dtype.
    """
    M, K = x2d.shape
    K_pad, N = wt_bf16.shape

    # Zero-pad the reduction axis only when hidden is not lane-aligned
    # (zero padding keeps the accumulation exact).  No M padding, no output
    # slice: partial edge blocks are masked on store by the cdiv grid.
    if K_pad != K:
        x2d = jnp.pad(x2d, ((0, 0), (0, K_pad - K)))

    budget = int(vmem_limit_bytes * 0.85)
    tm, tn, tk = _select_tiles(M, K_pad, N, budget)
    gm, gn, gk = pl.cdiv(M, tm), pl.cdiv(N, tn), K_pad // tk

    out_dtype = x2d.dtype
    cost = pl.CostEstimate(
        flops=2 * (gm * tm) * (gn * tn) * K_pad,
        transcendentals=0,
        bytes_accessed=int(
            gn * M * K_pad * 4                 # x re-read once per N tile
            + gm * K_pad * (gn * tn) * 2       # W^T re-read once per M tile
            + M * N * jnp.dtype(out_dtype).itemsize   # output written once
            + gm * gk * (gn * tn) * 4          # bias
        ),
    )

    if gk == 1:
        kernel = _linear_kernel_full_k
        grid = (gm, gn)
        in_specs = [
            pl.BlockSpec((tm, tk), lambda i, j: (i, 0)),
            pl.BlockSpec((tk, tn), lambda i, j: (0, j)),
            pl.BlockSpec((1, tn), lambda i, j: (0, j)),
        ]
        out_specs = pl.BlockSpec((tm, tn), lambda i, j: (i, j))
        scratch = []
        dims = ("parallel", "parallel")
    else:
        grid = (gm, gn, gk)
        in_specs = [
            pl.BlockSpec((tm, tk), lambda i, j, k: (i, k)),
            pl.BlockSpec((tk, tn), lambda i, j, k: (k, j)),
            pl.BlockSpec((1, tn), lambda i, j, k: (0, j)),
        ]
        out_specs = pl.BlockSpec((tm, tn), lambda i, j, k: (i, j))
        dims = ("parallel", "parallel", "arbitrary")
        if out_dtype == jnp.float32:
            kernel = _linear_kernel_split_f32out
            scratch = []
        else:
            kernel = _linear_kernel_split_acc
            scratch = [pltpu.VMEM((tm, tn), jnp.float32)]

    return pl.pallas_call(
        kernel,
        out_shape=jax.ShapeDtypeStruct((M, N), out_dtype),
        grid_spec=pltpu.PrefetchScalarGridSpec(
            num_scalar_prefetch=0,
            grid=grid,
            in_specs=in_specs,
            out_specs=out_specs,
            scratch_shapes=scratch,
        ),
        compiler_params=pltpu.CompilerParams(
            dimension_semantics=dims,
            vmem_limit_bytes=vmem_limit_bytes,
        ),
        cost_estimate=cost,
    )(x2d, wt_bf16, b_f32)


# ---------------------------------------------------------------------------
# Modules
# ---------------------------------------------------------------------------

class InnerLinear:
    """Deterministic synthetic inner module: Linear(hidden, hidden)."""

    # below this many MACs the pallas_call launch/grid overhead dominates
    _PALLAS_MIN_MACS = 1 << 18

    def __init__(self, hidden: int):
        kw, kb = jax.random.split(jax.random.PRNGKey(42))
        scale = 1.0 / jnp.sqrt(hidden)
        self.hidden = hidden
        self.weight = jax.random.uniform(
            kw, (hidden, hidden), jnp.float32, -scale, scale)
        self.bias = jax.random.uniform(
            kb, (hidden,), jnp.float32, -scale, scale)

        # Hoisted once at init: bf16 W^T, zero-padded on K to a lane-aligned
        # stripe.  Removes per-forward transpose/cast/pad HBM round trips and
        # halves weight DMA versus f32.
        k_pad = _round_up(hidden, 128)
        wt = self.weight.T.astype(jnp.bfloat16)
        self.wt_bf16 = jnp.pad(wt, ((0, k_pad - hidden), (0, 0)))
        self.b2d = self.bias.reshape(1, hidden)  # bias stays f32 for the epilogue

        # Generation-specific VMEM budget (64 MiB/TC on v7x, 128 MiB v5e/v6e).
        try:
            vmem_cap = int(pltpu.get_tpu_info().vmem_capacity_bytes)
        except Exception:
            vmem_cap = 64 * 1024 * 1024
        self._vmem_limit = min((vmem_cap * 3) // 4, 100 * 1024 * 1024)

    def __call__(self, x):
        # x: (batch, seq, hidden)
        B, S, H = x.shape
        x2d = x.reshape(B * S, H)
        if (B * S) * H * H < self._PALLAS_MIN_MACS:
            y2d = (jnp.dot(x2d.astype(jnp.bfloat16), self.wt_bf16[:H],
                           preferred_element_type=jnp.float32)
                   + self.b2d).astype(x.dtype)
        else:
            y2d = linear_pallas(x2d, self.wt_bf16, self.b2d, self._vmem_limit)
        return y2d.reshape(B, S, H)


class Wrapper:
    """Mirror of torch _Wrapper: pure pass-through delegation."""

    def __init__(self, module) -> None:
        self.module = module

    def __call__(self, *args, **kwargs):
        return self.module(*args, **kwargs)


if __name__ == "__main__":
    # Shapes chosen small but MXU-tile-aligned so the Pallas path is exercised:
    # M = B*S = 128, K = N = H = 256.
    B, S, H = 2, 64, 256
    x = jax.random.normal(jax.random.PRNGKey(0), (B, S, H), jnp.float32)

    model = Wrapper(InnerLinear(H))
    y = jax.block_until_ready(model(x))
    assert y.shape == (B, S, H)

    x2d = x.reshape(B * S, H)
    # Tight check against a reference using the same bf16 operands / f32 accum.
    ref_bf16 = (jnp.dot(x2d.astype(jnp.bfloat16),
                        model.module.weight.T.astype(jnp.bfloat16),
                        preferred_element_type=jnp.float32)
                + model.module.bias).reshape(B, S, H)
    assert jnp.allclose(y, ref_bf16, atol=2e-3, rtol=2e-3), (
        float(jnp.max(jnp.abs(y - ref_bf16))))

    # Loose check against the full-precision f32 reference (bf16 input rounding).
    ref_f32 = (jnp.dot(x2d, model.module.weight.T,
                       precision=jax.lax.Precision.HIGHEST)
               + model.module.bias).reshape(B, S, H)
    assert jnp.allclose(y, ref_f32, atol=5e-2, rtol=5e-2), (
        float(jnp.max(jnp.abs(y - ref_f32))))

    print("KERNEL_OK")
</pallas_src>

<mosaic_0001>
module attributes {stable_mosaic.version = 11 : i64} {
  func.func @_linear_kernel_full_k(%arg0: i32, %arg1: i32, %arg2: memref<128x256xf32, #tpu.memory_space<vmem>>, %arg3: memref<256x256xbf16, #tpu.memory_space<vmem>>, %arg4: memref<1x256xf32, #tpu.memory_space<vmem>>, %arg5: memref<128x256xf32, #tpu.memory_space<vmem>>) attributes {dimension_semantics = [#tpu.dimension_semantics<parallel>, #tpu.dimension_semantics<parallel>], iteration_bounds = array<i64: 1, 1>, scalar_prefetch = 0 : i64, scratch_operands = 0 : i64, tpu.core_type = #tpu.core_type<tc>, window_params = [{transform_indices = @transform_0, window_bounds = array<i64: 128, 256>}, {transform_indices = @transform_1, window_bounds = array<i64: 256, 256>}, {transform_indices = @transform_2, window_bounds = array<i64: 1, 256>}, {transform_indices = @transform_3, window_bounds = array<i64: 128, 256>}]} {
    %c0 = arith.constant 0 : index
    %c0_0 = arith.constant 0 : index
    %0 = vector.load %arg2[%c0, %c0_0] : memref<128x256xf32, #tpu.memory_space<vmem>>, vector<128x256xf32>
    %1 = arith.truncf %0 : vector<128x256xf32> to vector<128x256xbf16>
    %c0_1 = arith.constant 0 : index
    %c0_2 = arith.constant 0 : index
    %2 = vector.load %arg3[%c0_1, %c0_2] : memref<256x256xbf16, #tpu.memory_space<vmem>>, vector<256x256xbf16>
    %cst = arith.constant dense<0.000000e+00> : vector<128x256xf32>
    %3 = tpu.matmul %1, %2, %cst {dimension_numbers = #tpu.dot_dimension_numbers<[1], [0], [0], [1], [0, 0, 1, 1], [], []>} : vector<128x256xbf16>, vector<256x256xbf16>, vector<128x256xf32> -> vector<128x256xf32>
    %c0_3 = arith.constant 0 : index
    %c0_4 = arith.constant 0 : index
    %4 = vector.load %arg4[%c0_3, %c0_4] : memref<1x256xf32, #tpu.memory_space<vmem>>, vector<1x256xf32>
    %5 = vector.broadcast %4 : vector<1x256xf32> to vector<128x256xf32>
    %6 = arith.addf %3, %5 : vector<128x256xf32>
    %c0_5 = arith.constant 0 : index
    %c0_6 = arith.constant 0 : index
    %7 = vector.load %arg5[%c0_5, %c0_6] : memref<128x256xf32, #tpu.memory_space<vmem>>, vector<128x256xf32>
    tpu.vector_store %arg5[%c0_5, %c0_6], %6 {strides = array<i32>} : memref<128x256xf32, #tpu.memory_space<vmem>>, vector<128x256xf32>,
    return
  }
  func.func @transform_0(%arg0: i32, %arg1: i32) -> (i32, i32) {
    %c0_i32 = arith.constant 0 : i32
    %c0_i32_0 = arith.constant 0 : i32
    return %arg0, %c0_i32 : i32, i32
  }
  func.func @transform_1(%arg0: i32, %arg1: i32) -> (i32, i32) {
    %c0_i32 = arith.constant 0 : i32
    %c0_i32_0 = arith.constant 0 : i32
    return %c0_i32, %arg1 : i32, i32
  }
  func.func @transform_2(%arg0: i32, %arg1: i32) -> (i32, i32) {
    %c0_i32 = arith.constant 0 : i32
    %c0_i32_0 = arith.constant 0 : i32
    return %c0_i32, %arg1 : i32, i32
  }
  func.func @transform_3(%arg0: i32, %arg1: i32) -> (i32, i32) {
    %c0_i32 = arith.constant 0 : i32
    return %arg0, %arg1 : i32, i32
  }
}

</mosaic_0001>

<bundles_post_ra>
// kernel: tpu_custom_call.1
= control target key start
LH: loop header
LB: loop body
LE: loop exit
PB: predicated region body
PF: predicated region fallthrough
CT: control target
= control target key end

     0   :  { %8 = vsyncpa [#allocation3], 0  ;;  %s757_s0 = inlined_call_operand.hbm [shape: f32[128,256], index: 0, kind: input, shape index: {}]   ;;  %s758_s1 = inlined_call_operand.hbm [shape: bf16[256,256], index: 1, kind: input, shape index: {}]   ;;  %s759_s2 = inlined_call_operand.vmem [shape: f32[1,256], index: 2, kind: input, shape index: {}]   ;;  %s760_s3 = inlined_call_operand.hbm [shape: f32[128,256], index: 3, kind: output, shape index: {}]  }
   0x1   :  { %9 = vsyncpa [#allocation6], 0 }
   0x2   :  { %10 = vsyncpa [#allocation4], 0  ;;  %s649_s12 = smov [#allocation2]   ;;  %s577_s16 = scalar_lea.hbm %s757_s0, 4096 }
   0x3   :  { %s16_s13 = sshll.u32 %s649_s12, 4  ;;  %p578_p0 = scmp.ne.s32.totalorder %s757_s0, %s577_s16  ;;  %s17_s13 = int_to_ptr.vmem [resolvable:$true] %s16_s13 }
   0x4   :  { %p581_p1 = scmp.lt.u32.totalorder %s577_s16, %s757_s0 }
   0x6   :  { %p583_p2 = pnand %p581_p1, %p578_p0 }
   0x8   :  { %586 = shalt.err (!%p583_p2)
}
   0x9   :  { %s587_s21 = scalar_lea.vmem %s17_s13, 4096  ;;  %p592_p4 = scmp.lt.s32.totalorder %s17_s13, %s17_s13 }
   0xa   :  { %p588_p3 = scmp.ne.s32.totalorder %s17_s13, %s587_s21  ;;  %p593_p5 = scmp.lt.s32.totalorder %s587_s21, %s587_s21 }
   0xc   :  { %p594_p6 = por %p593_p5, %p592_p4 }
   0xe   :  { %p595_p7 = pnand %p594_p6, %p588_p3 }
  0x10   :  { %598 = shalt.err (!%p595_p7)
}
  0x11   :  { %s650_s22 = smov 256   ;;  %s651_s23 = smov 16  }
  0x12   :  { %22 = dma.hbm_to_vmem [thread:$0]  %s757_s0, 4096, %s17_s13, [#allocation3], %s650_s22, %s650_s22, %s651_s23  }
  0x13   :  { %s652_s26 = smov [#allocation5]   ;;  %s599_s30 = scalar_lea.hbm %s758_s1, 4096 }
  0x14   :  { %s28_s27 = sshll.u32 %s652_s26, 4  ;;  %p600_p8 = scmp.ne.s32.totalorder %s758_s1, %s599_s30  ;;  %s29_s27 = int_to_ptr.vmem [resolvable:$true] %s28_s27 }
  0x15   :  { %p603_p9 = scmp.lt.u32.totalorder %s599_s30, %s758_s1 }
  0x17   :  { %p605_p10 = pnand %p603_p9, %p600_p8 }
  0x19   :  { %608 = shalt.err (!%p605_p10)
}
  0x1a   :  { %s609_s8 = scalar_lea.vmem %s29_s27, 4096  ;;  %p614_p12 = scmp.lt.s32.totalorder %s29_s27, %s29_s27 }
  0x1b   :  { %p610_p11 = scmp.ne.s32.totalorder %s29_s27, %s609_s8  ;;  %p615_p13 = scmp.lt.s32.totalorder %s609_s8, %s609_s8 }
  0x1d   :  { %p616_p0 = por %p615_p13, %p614_p12 }
  0x1f   :  { %p617_p1 = pnand %p616_p0, %p610_p11 }
  0x21   :  { %620 = shalt.err (!%p617_p1)
}
  0x22   :  { %s653_s0 = smov 128   ;;  %s654_s9 = smov 8  }
  0x23   :  { %34 = dma.hbm_to_vmem [thread:$0]  %s758_s1, 4096, %s29_s27, [#allocation6], %s653_s0, %s653_s0, %s654_s9  }
  0x24   :  { %643 = dma.done.wait [#allocation3], 4096  }
  0x25   :  { %644 = vsyncadd [#allocation3], 4294963200 }
  0x26   :  { %645 = dma.done.wait [#allocation6], 4096  }
  0x27   :  { %646 = vsyncadd [#allocation6], 4294963200  ;;  %v529_v0 = vld [vmem:[#allocation5 + $0x4] ss:$8 sps:$4 sm:$0xff]   ;;  %v531_v1 = vld [vmem:[#allocation5] ss:$8 sps:$4 sm:$0xff]  }
  0x28   :  { %295 = vmatprep.subr.bf16.mxu0 %v529_v0  ;;  %490 = vmatprep.subr.bf16.mxu1 %v529_v0  ;;  %v532_v2 = vld [vmem:[#allocation5 + $0x14] ss:$8 sps:$4 sm:$0xff]   ;;  %v534_v3 = vld [vmem:[#allocation5 + $0x10] ss:$8 sps:$4 sm:$0xff]   ;;  %v535_v4 = vld [vmem:[#allocation5 + $0x24] ss:$8 sps:$4 sm:$0xff]  }
  0x29   :  { %296 = vmatpush1.bf16.msra.mxu0 %v531_v1  ;;  %506 = vmatpush1.bf16.msra.mxu1 %v531_v1  ;;  %v537_v5 = vld [vmem:[#allocation5 + $0x20] ss:$8 sps:$4 sm:$0xff]   ;;  %v538_v6 = vld [vmem:[#allocation5 + $0x34] ss:$8 sps:$4 sm:$0xff]   ;;  %v540_v7 = vld [vmem:[#allocation5 + $0x30] ss:$8 sps:$4 sm:$0xff]  }
  0x2a   :  { %297 = vmatprep.subr.bf16.mxu0 %v532_v2  ;;  %491 = vmatprep.subr.bf16.mxu1 %v532_v2  ;;  %v541_v8 = vld [vmem:[#allocation5 + $0x44] ss:$8 sps:$4 sm:$0xff]   ;;  %v543_v9 = vld [vmem:[#allocation5 + $0x40] ss:$8 sps:$4 sm:$0xff]   ;;  %v544_v10 = vld [vmem:[#allocation5 + $0x54] ss:$8 sps:$4 sm:$0xff]  }
  0x2b   :  { %v546_v11 = vld [vmem:[#allocation5 + $0x50] ss:$8 sps:$4 sm:$0xff]   ;;  %v547_v12 = vld [vmem:[#allocation5 + $0x64] ss:$8 sps:$4 sm:$0xff]   ;;  %v549_v18 = vld [vmem:[#allocation5 + $0x60] ss:$8 sps:$4 sm:$0xff]  }
  0x2c   :  { %v44_v13 = vld [vmem:[#allocation2 + $0x8] sm:$0xff]  ;;  %v46_v14 = vld [vmem:[#allocation2 + $0x18] sm:$0xff]  ;;  %v43_v38 = vld [vmem:[#allocation2] sm:$0xff] }
  0x2d   :  { %298 = vmatpush1.bf16.msra.mxu0 %v534_v3  ;;  %507 = vmatpush1.bf16.msra.mxu1 %v534_v3  ;;  %v76_v15 = vpack.c.bf16 %v46_v14, %v44_v13  ;;  %v60_v16 = vld [vmem:[#allocation2 + $0x88] sm:$0xff]  ;;  %v62_v17 = vld [vmem:[#allocation2 + $0x98] sm:$0xff]  ;;  %v45_v39 = vld [vmem:[#allocation2 + $0x10] sm:$0xff] }
  0x2e   :  { %299 = vmatprep.subr.bf16.mxu0 %v535_v4  ;;  %492 = vmatprep.subr.bf16.mxu1 %v535_v4  ;;  %v84_v19 = vpack.c.bf16 %v62_v17, %v60_v16  ;;  %v550_v20 = vld [vmem:[#allocation5 + $0x74] ss:$8 sps:$4 sm:$0xff]   ;;  %v552_v21 = vld [vmem:[#allocation5 + $0x70] ss:$8 sps:$4 sm:$0xff]   ;;  %v553_v22 = vld [vmem:[#allocation5 + $0x84] ss:$8 sps:$4 sm:$0xff]   ;;  %v75_v46 = vpack.c.bf16 %v45_v39, %v43_v38  ;;  %v125_v16 = vlaneseq }
  0x2f   :  { %327 = vmatprep.mubr.bf16.mxu0 %v76_v15  ;;  %v555_v23 = vld [vmem:[#allocation5 + $0x80] ss:$8 sps:$4 sm:$0xff]   ;;  %v556_v24 = vld [vmem:[#allocation5 + $0x94] ss:$8 sps:$4 sm:$0xff]   ;;  %v558_v25 = vld [vmem:[#allocation5 + $0x90] ss:$8 sps:$4 sm:$0xff]  }
  0x30   :  { %367 = vmatprep.mubr.bf16.mxu1 %v84_v19  ;;  %v559_v26 = vld [vmem:[#allocation5 + $0xa4] ss:$8 sps:$4 sm:$0xff]   ;;  %v561_v27 = vld [vmem:[#allocation5 + $0xa0] ss:$8 sps:$4 sm:$0xff]   ;;  %v562_v28 = vld [vmem:[#allocation5 + $0xb4] ss:$8 sps:$4 sm:$0xff]  }
  0x31   :  { %300 = vmatpush1.bf16.msra.mxu0 %v537_v5  ;;  %508 = vmatpush1.bf16.msra.mxu1 %v537_v5  ;;  %v564_v29 = vld [vmem:[#allocation5 + $0xb0] ss:$8 sps:$4 sm:$0xff]   ;;  %v565_v30 = vld [vmem:[#allocation5 + $0xc4] ss:$8 sps:$4 sm:$0xff]   ;;  %v567_v31 = vld [vmem:[#allocation5 + $0xc0] ss:$8 sps:$4 sm:$0xff]  }
  0x32   :  { %301 = vmatprep.subr.bf16.mxu0 %v538_v6  ;;  %493 = vmatprep.subr.bf16.mxu1 %v538_v6  ;;  %v568_v32 = vld [vmem:[#allocation5 + $0xd4] ss:$8 sps:$4 sm:$0xff]   ;;  %v570_v33 = vld [vmem:[#allocation5 + $0xd0] ss:$8 sps:$4 sm:$0xff]   ;;  %v571_v34 = vld [vmem:[#allocation5 + $0xe4] ss:$8 sps:$4 sm:$0xff]  }
  0x33   :  { %v573_v35 = vld [vmem:[#allocation5 + $0xe0] ss:$8 sps:$4 sm:$0xff]   ;;  %v574_v36 = vld [vmem:[#allocation5 + $0xf4] ss:$8 sps:$4 sm:$0xff]   ;;  %v576_v37 = vld [vmem:[#allocation5 + $0xf0] ss:$8 sps:$4 sm:$0xff]  }
  0x34   :  { %v59_v40 = vld [vmem:[#allocation2 + $0x80] sm:$0xff]  ;;  %v61_v41 = vld [vmem:[#allocation2 + $0x90] sm:$0xff]  ;;  %v48_v42 = vld [vmem:[#allocation2 + $0x28] sm:$0xff]  ;;  %v126_v17 = vshrl.u32 %v125_v16, 7 }
  0x35   :  { %302 = vmatpush1.bf16.msra.mxu0 %v540_v7  ;;  %509 = vmatpush1.bf16.msra.mxu1 %v540_v7  ;;  %v50_v43 = vld [vmem:[#allocation2 + $0x38] sm:$0xff]  ;;  %v64_v44 = vld [vmem:[#allocation2 + $0xa8] sm:$0xff]  ;;  %v83_v47 = vpack.c.bf16 %v61_v41, %v59_v40  ;;  %v47_v50 = vld [vmem:[#allocation2 + $0x20] sm:$0xff] }
  0x36   :  { %303 = vmatprep.subr.bf16.mxu0 %v541_v8  ;;  %494 = vmatprep.subr.bf16.mxu1 %v541_v8  ;;  %v66_v45 = vld [vmem:[#allocation2 + $0xb8] sm:$0xff]  ;;  %v78_v48 = vpack.c.bf16 %v50_v43, %v48_v42  ;;  %v49_v51 = vld [vmem:[#allocation2 + $0x30] sm:$0xff]  ;;  %v63_v52 = vld [vmem:[#allocation2 + $0xa0] sm:$0xff] }
  0x37   :  { %v86_v49 = vpack.c.bf16 %v66_v45, %v64_v44  ;;  %v65_v53 = vld [vmem:[#allocation2 + $0xb0] sm:$0xff]  ;;  %v52_v54 = vld [vmem:[#allocation2 + $0x48] sm:$0xff]  ;;  %v54_v55 = vld [vmem:[#allocation2 + $0x58] sm:$0xff]  ;;  %v77_v58 = vpack.c.bf16 %v49_v51, %v47_v50 }
  0x38   :  { %v68_v56 = vld [vmem:[#allocation2 + $0xc8] sm:$0xff]  ;;  %v70_v57 = vld [vmem:[#allocation2 + $0xd8] sm:$0xff]  ;;  %v85_v59 = vpack.c.bf16 %v65_v53, %v63_v52  ;;  %v80_v60 = vpack.c.bf16 %v54_v55, %v52_v54  ;;  %v51_v62 = vld [vmem:[#allocation2 + $0x40] sm:$0xff] }
  0x39   :  { %304 = vmatpush1.bf16.msra.mxu0 %v543_v9  ;;  %510 = vmatpush1.bf16.msra.mxu1 %v543_v9  ;;  %v88_v61 = vpack.c.bf16 %v70_v57, %v68_v56  ;;  %v53_v63 = vld [vmem:[#allocation2 + $0x50] sm:$0xff]  ;;  %v67_v0 = vld [vmem:[#allocation2 + $0xc0] sm:$0xff]  ;;  %v56_v2 = vld [vmem:[#allocation2 + $0x68] sm:$0xff] }
  0x3a   :  { %305 = vmatprep.subr.bf16.mxu0 %v544_v10  ;;  %495 = vmatprep.subr.bf16.mxu1 %v544_v10  ;;  %v69_v1 = vld [vmem:[#allocation2 + $0xd0] sm:$0xff]  ;;  %v58_v3 = vld [vmem:[#allocation2 + $0x78] sm:$0xff]  ;;  %v72_v4 = vld [vmem:[#allocation2 + $0xe8] sm:$0xff]  ;;  %v79_v6 = vpack.c.bf16 %v53_v63, %v51_v62 }
  0x3b   :  { %v74_v5 = vld [vmem:[#allocation2 + $0xf8] sm:$0xff]  ;;  %v87_v7 = vpack.c.bf16 %v69_v1, %v67_v0  ;;  %v82_v8 = vpack.c.bf16 %v58_v3, %v56_v2  ;;  %v55_v10 = vld [vmem:[#allocation2 + $0x60] sm:$0xff]  ;;  %v73_v13 = vld [vmem:[#allocation2 + $0xf0] sm:$0xff] }
  0x3c   :  { %v90_v9 = vpack.c.bf16 %v74_v5, %v72_v4  ;;  %v123_v19 = vld [vmem:[%s759_s2] sm:$0x3]  ;;  %s655_s2 = smov [#allocation7]  }
  0x3d   :  { %306 = vmatpush1.bf16.msra.mxu0 %v546_v11  ;;  %511 = vmatpush1.bf16.msra.mxu1 %v546_v11  ;;  %v57_v11 = vld [vmem:[#allocation2 + $0x70] sm:$0xff]  ;;  %s445_s13 = sshll.u32 %s655_s2, 4  ;;  %s446_s13 = int_to_ptr.vmem [resolvable:$true] %s445_s13 }
  0x3e   :  { %307 = vmatprep.subr.bf16.mxu0 %v547_v12  ;;  %496 = vmatprep.subr.bf16.mxu1 %v547_v12  ;;  %v71_v12 = vld [vmem:[#allocation2 + $0xe0] sm:$0xff]  ;;  %v81_v14 = vpack.c.bf16 %v57_v11, %v55_v10  ;;  %s621_s14 = scalar_lea.vmem %s446_s13, 4096  ;;  %p626_p3 = scmp.lt.s32.totalorder %s446_s13, %s446_s13 }
  0x3f   :  { %v89_v15 = vpack.c.bf16 %v73_v13, %v71_v12  ;;  %p622_p2 = scmp.ne.s32.totalorder %s446_s13, %s621_s14  ;;  %p627_p4 = scmp.lt.s32.totalorder %s621_s14, %s621_s14 }
  0x41   :  { %308 = vmatpush1.bf16.msra.mxu0 %v549_v18  ;;  %512 = vmatpush1.bf16.msra.mxu1 %v549_v18  ;;  %v127_v18 = vsub.s32 0, %v126_v17  ;;  %p628_p5 = por %p627_p4, %p626_p3 }
  0x42   :  { %309 = vmatprep.subr.bf16.mxu0 %v550_v20  ;;  %497 = vmatprep.subr.bf16.mxu1 %v550_v20  ;;  %v131_v20 = vsub.s32 1, %v126_v17 }
  0x43   :  { %p629_p6 = pnand %p628_p5, %p622_p2 }
  0x45   :  { %310 = vmatpush1.bf16.msra.mxu0 %v552_v21  ;;  %513 = vmatpush1.bf16.msra.mxu1 %v552_v21  ;;  %v706_v21 = vrot.slane %v123_v19, %v127_v18 }
  0x46   :  { %311 = vmatprep.subr.bf16.mxu0 %v553_v22  ;;  %498 = vmatprep.subr.bf16.mxu1 %v553_v22  ;;  %v708_v22 = vrot.slane %v123_v19, %v131_v20 }
  0x49   :  { %312 = vmatpush1.bf16.msra.mxu0 %v555_v23  ;;  %514 = vmatpush1.bf16.msra.mxu1 %v555_v23 }
  0x4a   :  { %313 = vmatprep.subr.bf16.mxu0 %v556_v24  ;;  %499 = vmatprep.subr.bf16.mxu1 %v556_v24 }
  0x4d   :  { %314 = vmatpush1.bf16.msra.mxu0 %v558_v25  ;;  %515 = vmatpush1.bf16.msra.mxu1 %v558_v25 }
  0x4e   :  { %315 = vmatprep.subr.bf16.mxu0 %v559_v26  ;;  %500 = vmatprep.subr.bf16.mxu1 %v559_v26 }
  0x51   :  { %316 = vmatpush1.bf16.msra.mxu0 %v561_v27  ;;  %516 = vmatpush1.bf16.msra.mxu1 %v561_v27 }
  0x52   :  { %317 = vmatprep.subr.bf16.mxu0 %v562_v28  ;;  %501 = vmatprep.subr.bf16.mxu1 %v562_v28 }
  0x55   :  { %318 = vmatpush1.bf16.msra.mxu0 %v564_v29  ;;  %517 = vmatpush1.bf16.msra.mxu1 %v564_v29 }
  0x56   :  { %319 = vmatprep.subr.bf16.mxu0 %v565_v30  ;;  %502 = vmatprep.subr.bf16.mxu1 %v565_v30 }
  0x59   :  { %320 = vmatpush1.bf16.msra.mxu0 %v567_v31  ;;  %518 = vmatpush1.bf16.msra.mxu1 %v567_v31 }
  0x5a   :  { %321 = vmatprep.subr.bf16.mxu0 %v568_v32  ;;  %503 = vmatprep.subr.bf16.mxu1 %v568_v32 }
  0x5d   :  { %322 = vmatpush1.bf16.msra.mxu0 %v570_v33  ;;  %519 = vmatpush1.bf16.msra.mxu1 %v570_v33 }
  0x5e   :  { %323 = vmatprep.subr.bf16.mxu0 %v571_v34  ;;  %504 = vmatprep.subr.bf16.mxu1 %v571_v34 }
  0x61   :  { %324 = vmatpush1.bf16.msra.mxu0 %v573_v35  ;;  %520 = vmatpush1.bf16.msra.mxu1 %v573_v35 }
  0x62   :  { %325 = vmatprep.subr.bf16.mxu0 %v574_v36  ;;  %505 = vmatprep.subr.bf16.mxu1 %v574_v36 }
  0x65   :  { %326 = vmatpush1.bf16.msra.mxu0 %v576_v37  ;;  %521 = vmatpush1.bf16.msra.mxu1 %v576_v37 }
  0x68   :  { %328 = vmatmul.mubr.bf16.vlgmr.msra.gmra.mrb[0].mxu0 %v75_v46  ;;  %368 = vmatmul.mubr.bf16.vlgmr.msra.gmra.mrb[0].mxu1 %v83_v47 }
  0x69   :  { %337 = vmatprep.mubr.bf16.mxu0 %v78_v48  ;;  %377 = vmatprep.mubr.bf16.mxu1 %v86_v49 }
  0x70   :  { %338 = vmatmul.mubr.bf16.gmra.mrb[4].mxu0 %v77_v58  ;;  %378 = vmatmul.mubr.bf16.gmra.mrb[4].mxu1 %v85_v59 }
  0x71   :  { %347 = vmatprep.mubr.bf16.mxu0 %v80_v60  ;;  %387 = vmatprep.mubr.bf16.mxu1 %v88_v61 }
  0x78   :  { %348 = vmatmul.mubr.bf16.gmra.mrb[8].mxu0 %v79_v6  ;;  %388 = vmatmul.mubr.bf16.gmra.mrb[8].mxu1 %v87_v7 }
  0x79   :  { %357 = vmatprep.mubr.bf16.mxu0 %v82_v8  ;;  %397 = vmatprep.mubr.bf16.mxu1 %v90_v9 }
  0x80   :  { %358 = vmatmul.mubr.bf16.gmra.mrb[12].mxu0 %v81_v14  ;;  %398 = vmatmul.mubr.bf16.gmra.mrb[12].mxu1 %v89_v15 }
 0x13b   :  { %v329_v23 = vpop.f32.mrb[0].mxu0  ;;  %v369_v24 = vpop.f32.mrb[0].mxu1 }
 0x13c   :  { %v330_v25 = vadd.f32 %v329_v23, %v706_v21  ;;  %v370_v26 = vadd.f32 %v369_v24, %v706_v21  ;;  %v331_v27 = vpop.f32.mrb[1].mxu0  ;;  %v371_v28 = vpop.f32.mrb[1].mxu1 }
 0x13d   :  { %v332_v29 = vadd.f32 %v331_v27, %v708_v22  ;;  %v372_v30 = vadd.f32 %v371_v28, %v708_v22  ;;  %v333_v31 = vpop.f32.mrb[2].mxu0  ;;  %v373_v32 = vpop.f32.mrb[2].mxu1 }
 0x13e   :  { %408 = vst [vmem:[#allocation7] sm:$0xff] %v330_v25  ;;  %424 = vst [vmem:[#allocation7 + $0x80] sm:$0xff] %v370_v26  ;;  %v334_v33 = vadd.f32 %v333_v31, %v706_v21  ;;  %v374_v34 = vadd.f32 %v373_v32, %v706_v21  ;;  %v335_v35 = vpop.f32.mrb[3].mxu0  ;;  %v375_v36 = vpop.f32.mrb[3].mxu1 }
 0x13f   :  { %409 = vst [vmem:[#allocation7 + $0x8] sm:$0xff] %v332_v29  ;;  %425 = vst [vmem:[#allocation7 + $0x88] sm:$0xff] %v372_v30  ;;  %v336_v37 = vadd.f32 %v335_v35, %v708_v22  ;;  %v376_v38 = vadd.f32 %v375_v36, %v708_v22 }
 0x140   :  { %410 = vst [vmem:[#allocation7 + $0x10] sm:$0xff] %v334_v33  ;;  %426 = vst [vmem:[#allocation7 + $0x90] sm:$0xff] %v374_v34 }
 0x141   :  { %411 = vst [vmem:[#allocation7 + $0x18] sm:$0xff] %v336_v37  ;;  %427 = vst [vmem:[#allocation7 + $0x98] sm:$0xff] %v376_v38 }
 0x143   :  { %v339_v39 = vpop.f32.mrb[4].mxu0  ;;  %v379_v40 = vpop.f32.mrb[4].mxu1 }
 0x144   :  { %v340_v41 = vadd.f32 %v339_v39, %v706_v21  ;;  %v380_v42 = vadd.f32 %v379_v40, %v706_v21  ;;  %v341_v43 = vpop.f32.mrb[5].mxu0  ;;  %v381_v44 = vpop.f32.mrb[5].mxu1 }
 0x145   :  { %v342_v45 = vadd.f32 %v341_v43, %v708_v22  ;;  %v382_v46 = vadd.f32 %v381_v44, %v708_v22  ;;  %v343_v47 = vpop.f32.mrb[6].mxu0  ;;  %v383_v48 = vpop.f32.mrb[6].mxu1 }
 0x146   :  { %412 = vst [vmem:[#allocation7 + $0x20] sm:$0xff] %v340_v41  ;;  %428 = vst [vmem:[#allocation7 + $0xa0] sm:$0xff] %v380_v42  ;;  %v344_v49 = vadd.f32 %v343_v47, %v706_v21  ;;  %v384_v50 = vadd.f32 %v383_v48, %v706_v21  ;;  %v345_v51 = vpop.f32.mrb[7].mxu0  ;;  %v385_v52 = vpop.f32.mrb[7].mxu1 }
 0x147   :  { %413 = vst [vmem:[#allocation7 + $0x28] sm:$0xff] %v342_v45  ;;  %429 = vst [vmem:[#allocation7 + $0xa8] sm:$0xff] %v382_v46  ;;  %v346_v53 = vadd.f32 %v345_v51, %v708_v22  ;;  %v386_v54 = vadd.f32 %v385_v52, %v708_v22 }
 0x148   :  { %414 = vst [vmem:[#allocation7 + $0x30] sm:$0xff] %v344_v49  ;;  %430 = vst [vmem:[#allocation7 + $0xb0] sm:$0xff] %v384_v50 }
 0x149   :  { %415 = vst [vmem:[#allocation7 + $0x38] sm:$0xff] %v346_v53  ;;  %431 = vst [vmem:[#allocation7 + $0xb8] sm:$0xff] %v386_v54 }
 0x14b   :  { %v349_v55 = vpop.f32.mrb[8].mxu0  ;;  %v389_v56 = vpop.f32.mrb[8].mxu1 }
 0x14c   :  { %v350_v57 = vadd.f32 %v349_v55, %v706_v21  ;;  %v390_v58 = vadd.f32 %v389_v56, %v706_v21  ;;  %v351_v59 = vpop.f32.mrb[9].mxu0  ;;  %v391_v60 = vpop.f32.mrb[9].mxu1 }
 0x14d   :  { %v352_v61 = vadd.f32 %v351_v59, %v708_v22  ;;  %v392_v62 = vadd.f32 %v391_v60, %v708_v22  ;;  %v353_v63 = vpop.f32.mrb[10].mxu0  ;;  %v393_v0 = vpop.f32.mrb[10].mxu1 }
 0x14e   :  { %416 = vst [vmem:[#allocation7 + $0x40] sm:$0xff] %v350_v57  ;;  %432 = vst [vmem:[#allocation7 + $0xc0] sm:$0xff] %v390_v58  ;;  %v354_v1 = vadd.f32 %v353_v63, %v706_v21  ;;  %v394_v2 = vadd.f32 %v393_v0, %v706_v21  ;;  %v355_v3 = vpop.f32.mrb[11].mxu0  ;;  %v395_v4 = vpop.f32.mrb[11].mxu1 }
 0x14f   :  { %417 = vst [vmem:[#allocation7 + $0x48] sm:$0xff] %v352_v61  ;;  %433 = vst [vmem:[#allocation7 + $0xc8] sm:$0xff] %v392_v62  ;;  %v356_v5 = vadd.f32 %v355_v3, %v708_v22  ;;  %v396_v6 = vadd.f32 %v395_v4, %v708_v22 }
 0x150   :  { %418 = vst [vmem:[#allocation7 + $0x50] sm:$0xff] %v354_v1  ;;  %434 = vst [vmem:[#allocation7 + $0xd0] sm:$0xff] %v394_v2 }
 0x151   :  { %419 = vst [vmem:[#allocation7 + $0x58] sm:$0xff] %v356_v5  ;;  %435 = vst [vmem:[#allocation7 + $0xd8] sm:$0xff] %v396_v6 }
 0x153   :  { %v359_v7 = vpop.f32.mrb[12].mxu0  ;;  %v399_v8 = vpop.f32.mrb[12].mxu1 }
 0x154   :  { %v360_v9 = vadd.f32 %v359_v7, %v706_v21  ;;  %v400_v10 = vadd.f32 %v399_v8, %v706_v21  ;;  %v361_v11 = vpop.f32.mrb[13].mxu0  ;;  %v401_v12 = vpop.f32.mrb[13].mxu1 }
 0x155   :  { %v362_v13 = vadd.f32 %v361_v11, %v708_v22  ;;  %v402_v14 = vadd.f32 %v401_v12, %v708_v22  ;;  %v363_v15 = vpop.f32.mrb[14].mxu0  ;;  %v403_v16 = vpop.f32.mrb[14].mxu1 }
 0x156   :  { %420 = vst [vmem:[#allocation7 + $0x60] sm:$0xff] %v360_v9  ;;  %436 = vst [vmem:[#allocation7 + $0xe0] sm:$0xff] %v400_v10  ;;  %v364_v17 = vadd.f32 %v363_v15, %v706_v21  ;;  %v404_v18 = vadd.f32 %v403_v16, %v706_v21  ;;  %v365_v19 = vpop.f32.mrb[15].mxu0  ;;  %v405_v20 = vpop.f32.mrb[15].mxu1 }
 0x157   :  { %421 = vst [vmem:[#allocation7 + $0x68] sm:$0xff] %v362_v13  ;;  %437 = vst [vmem:[#allocation7 + $0xe8] sm:$0xff] %v402_v14  ;;  %v366_v23 = vadd.f32 %v365_v19, %v708_v22  ;;  %v406_v24 = vadd.f32 %v405_v20, %v708_v22 }
 0x158   :  { %422 = vst [vmem:[#allocation7 + $0x70] sm:$0xff] %v364_v17  ;;  %438 = vst [vmem:[#allocation7 + $0xf0] sm:$0xff] %v404_v18 }
 0x159   :  { %423 = vst [vmem:[#allocation7 + $0x78] sm:$0xff] %v366_v23  ;;  %439 = vst [vmem:[#allocation7 + $0xf8] sm:$0xff] %v406_v24 }
 0x15a   :  { %632 = shalt.err (!%p629_p6)
}
 0x15b   :  { %s633_s17 = scalar_lea.hbm %s760_s3, 4096 }
 0x15c   :  { %p634_p7 = scmp.ne.s32.totalorder %s760_s3, %s633_s17  ;;  %p637_p8 = scmp.lt.u32.totalorder %s633_s17, %s760_s3 }
 0x15e   :  { %p639_p9 = pnand %p637_p8, %p634_p7 }
 0x160   :  { %642 = shalt.err (!%p639_p9)
}
 0x161   :  { %451 = dma.vmem_to_hbm [thread:$0]  %s446_s13, 4096, %s760_s3, [#allocation4], %s650_s22, %s650_s22, %s651_s23  }
 0x162   :  { %647 = dma.done.wait [#allocation4], 4096  }
 0x163   :  { %648 = vsyncadd [#allocation4], 4294963200 }
 0x164   :  { %455 = vsyncpa [#allocation3], 1 }
 0x165   :  { %456 = vsyncpa [#allocation6], 1 }
 0x166   :  { %457 = vsyncpa [#allocation4], 1 }

</bundles_post_ra>
